<compile_context>
chip_gen: v6e
topology: v6e:2x2x1
jax: 0.10.0
libtpu: 0.0.40
codegen_flags: <defaults>
</compile_context>

<pallas_src>
import jax
import jax.numpy as jnp
from jax.experimental import pallas as pl
from jax.experimental.pallas import tpu as pltpu


# -----------------------------------------------------------------------------
# Kernel
# -----------------------------------------------------------------------------
def _conv1x1_kernel(w_ref, x_ref, o_ref):
    # w_ref: (C, C) weight, resident every grid step.
    # x_ref: (Bn, C, T) activation tile, spatial axis on the 128-lane axis.
    # o_ref: (Bn, C, T) output tile, written directly in the input's dtype.
    w = w_ref[...]
    # Static unroll over the (small, <= 8) batch block: each element is one
    # lane-dense (C,C)@(C,T) MXU matmul written straight to its output row --
    # no transposes, f32 accumulation only inside the MXU.
    for b in range(x_ref.shape[0]):
        o_ref[b] = jnp.dot(
            w, x_ref[b], preferred_element_type=jnp.float32
        ).astype(o_ref.dtype)


# -----------------------------------------------------------------------------
# Tiling / wrapper
# -----------------------------------------------------------------------------
def _vmem_capacity_bytes():
    """Physical VMEM of the current generation; conservative fallback."""
    try:
        return int(pltpu.get_tpu_info().vmem_capacity_bytes)
    except Exception:
        return 64 << 20  # v7x-sized (smallest) assumption if query unavailable


def _choose_tiles(N, C, L, itemsize, budget_bytes, *, max_bn=8, min_blocks=2):
    """Pick (Bn, T) batch/spatial block sizes.

    Prefers T == L (one contiguous DMA per batch element), then folds batch
    elements into the block, all sized against `budget_bytes` of
    double-buffered VMEM working set.
    """
    # Per spatial column, per batch element: 2x input + 2x output buffers in
    # the native dtype, plus an f32 matmul intermediate.
    per_col = C * (4 * itemsize + 4)
    avail = max(budget_bytes - 2 * C * C * itemsize, 128 * per_col)
    max_cols = max(128, avail // per_col)  # budget for Bn * T columns per step

    if L <= max_cols:
        T = L  # full spatial axis: contiguous DMA, unmasked lane-dense stores
    else:
        cap = int((max_cols // 128) * 128)
        T = cap
        # Prefer a multiple of 128 that divides L exactly (no ragged tile).
        for t in range(cap, 127, -128):
            if L % t == 0:
                T = t
                break

    bn = int(min(N, max_bn, max(1, max_cols // T)))
    while bn > 1 and N % bn != 0:  # same (unmasked) block shape every step
        bn -= 1

    def n_blocks(b, t):
        return pl.cdiv(N, b) * pl.cdiv(L, t)

    # Keep >=2 grid blocks when possible so both v7x TensorCores get work
    # (negligible cost on single-TC v5e/v6e).
    if n_blocks(bn, T) < min_blocks:
        if bn > 1:
            bn = max(1, bn // 2)
            while bn > 1 and N % bn != 0:
                bn -= 1
        elif T == L and L >= 256:
            half = ((L // 2 + 127) // 128) * 128  # ~L/2, multiple of 128
            if 0 < half < L:
                T = half
    return bn, T


def conv1x1_forward(x_ncl, w):
    """x_ncl: (N, C, L), w: (C, C) in x's dtype.  Returns z[n] = w @ x[n]."""
    N, C, L = x_ncl.shape
    itemsize = jnp.dtype(x_ncl.dtype).itemsize

    # Generation-aware VMEM spend: ~48 MiB scoped limit on v7x (64 MiB/TC),
    # ~96 MiB on v5e/v6e (128 MiB).  The tile budget leaves headroom for
    # Mosaic-internal scratch.
    vmem_cap = _vmem_capacity_bytes()
    vmem_limit = int(min((vmem_cap * 3) // 4, 96 << 20))
    budget = (vmem_limit * 7) // 8

    Bn, T = _choose_tiles(N, C, L, itemsize, budget)
    grid = (pl.cdiv(N, Bn), pl.cdiv(L, T))

    cost = pl.CostEstimate(
        flops=2 * N * C * C * L,
        transcendentals=0,
        bytes_accessed=2 * N * C * L * itemsize + C * C * itemsize,
    )

    return pl.pallas_call(
        _conv1x1_kernel,
        out_shape=jax.ShapeDtypeStruct((N, C, L), x_ncl.dtype),
        grid_spec=pltpu.PrefetchScalarGridSpec(
            num_scalar_prefetch=0,
            grid=grid,
            in_specs=[
                pl.BlockSpec((C, C), lambda n, j: (0, 0)),         # W resident
                pl.BlockSpec((Bn, C, T), lambda n, j: (n, 0, j)),  # x tile
            ],
            out_specs=pl.BlockSpec((Bn, C, T), lambda n, j: (n, 0, j)),
        ),
        compiler_params=pltpu.CompilerParams(
            # Both axes independent -> megacore-shardable on v7x (2 TCs).
            dimension_semantics=("parallel", "parallel"),
            vmem_limit_bytes=vmem_limit,
        ),
        cost_estimate=cost,
    )(w, x_ncl)


# -----------------------------------------------------------------------------
# Module
# -----------------------------------------------------------------------------
class InvertibleConv1x1:
    """JAX/Pallas port of the non-LU-decomposed InvertibleConv1x1 forward.

    # TODO(synk): the LU_decomposed=True branch and the min_singular SVD
    # clipping path are not ported (tiny CxC host-side linalg, no Pallas win).
    """

    def __init__(self, num_channels, seed=0, dtype=jnp.float32):
        self.num_channels = num_channels
        self.dtype = dtype
        # Deterministic init: orthogonal matrix via QR of a random normal,
        # mirroring np.linalg.qr(np.random.randn(C, C))[0].
        key = jax.random.PRNGKey(seed)
        w_init = jnp.linalg.qr(
            jax.random.normal(key, (num_channels, num_channels), jnp.float32)
        )[0]
        self.weight = w_init.astype(jnp.float32)
        self._refresh_cached()

    def _refresh_cached(self):
        # Hoisted out of the per-call hot path.  NOTE: PyTorch recomputes
        # slogdet/inverse every call; if self.weight is updated (training),
        # call set_weight() so these do not go stale.
        # slogdet sign is intentionally discarded (log|det|, Glow convention).
        self._logabsdet = jnp.linalg.slogdet(self.weight)[1]
        # TODO(synk): PyTorch inverts in float64; TPU float32 inverse used here.
        self._w_inv = jnp.linalg.inv(self.weight)
        # Pre-cast once to the compute dtype so no per-call astype op
        # serializes ahead of the kernel.
        self._w_fwd_c = self.weight.astype(self.dtype)
        self._w_inv_c = self._w_inv.astype(self.dtype)

    def set_weight(self, w):
        self.weight = jnp.asarray(w, jnp.float32)
        self._refresh_cached()

    def __call__(self, x, logdet=None, reverse=False):
        # x layout: NCHW (matches the PyTorch module).
        N, C, H, W = x.shape
        assert C == self.num_channels
        pixels = H * W
        dlogdet = self._logabsdet * pixels

        w = self._w_fwd_c if not reverse else self._w_inv_c
        if w.dtype != x.dtype:  # rare path; normally pre-cast at init
            w = w.astype(x.dtype)

        # NCHW viewed as (N, C, H*W): a free reshape, no transpose, no pad copy.
        z = conv1x1_forward(x.reshape(N, C, H * W), w).reshape(N, C, H, W)

        if logdet is not None:
            logdet = logdet + dlogdet if not reverse else logdet - dlogdet
        return z, logdet


if __name__ == "__main__":
    N, C, H, W = 2, 4, 16, 16
    key = jax.random.PRNGKey(0)
    kx, _ = jax.random.split(key)
    x = jax.random.normal(kx, (N, C, H, W), jnp.float32)
    logdet = jnp.zeros((N,), jnp.float32)

    module = InvertibleConv1x1(num_channels=C, seed=0)

    z, new_logdet = module(x, logdet=logdet, reverse=False)
    z = jax.block_until_ready(z)
    new_logdet = jax.block_until_ready(new_logdet)

    # Reference check against plain-JAX 1x1 conv (einsum over channels).
    z_ref = jnp.einsum("oc,nchw->nohw", module.weight, x)
    assert jnp.allclose(z, z_ref, atol=1e-5, rtol=1e-5)

    # Round-trip sanity: reverse should invert forward.
    x_rec, _ = module(z, logdet=None, reverse=True)
    x_rec = jax.block_until_ready(x_rec)
    assert jnp.allclose(x_rec, x, atol=1e-4, rtol=1e-4)

    print("KERNEL_OK")
</pallas_src>

<mosaic_0001>
module attributes {stable_mosaic.version = 11 : i64} {
  func.func @_conv1x1_kernel(%arg0: i32, %arg1: i32, %arg2: memref<4x4xf32, #tpu.memory_space<vmem>>, %arg3: memref<1x4x256xf32, #tpu.memory_space<vmem>>, %arg4: memref<1x4x256xf32, #tpu.memory_space<vmem>>) attributes {dimension_semantics = [#tpu.dimension_semantics<parallel>, #tpu.dimension_semantics<parallel>], iteration_bounds = array<i64: 2, 1>, scalar_prefetch = 0 : i64, scratch_operands = 0 : i64, tpu.core_type = #tpu.core_type<tc>, window_params = [{pipeline_mode = #tpu.pipeline_mode<synchronous>, transform_indices = @transform_0, window_bounds = array<i64: 4, 4>}, {transform_indices = @transform_1, window_bounds = array<i64: 1, 4, 256>}, {transform_indices = @transform_2, window_bounds = array<i64: 1, 4, 256>}]} {
    %c0 = arith.constant 0 : index
    %c0_0 = arith.constant 0 : index
    %0 = vector.load %arg2[%c0, %c0_0] : memref<4x4xf32, #tpu.memory_space<vmem>>, vector<4x4xf32>
    %c0_1 = arith.constant 0 : index
    %c0_2 = arith.constant 0 : index
    %c0_3 = arith.constant 0 : index
    %1 = vector.load %arg3[%c0_1, %c0_2, %c0_3] : memref<1x4x256xf32, #tpu.memory_space<vmem>>, vector<1x4x256xf32>
    %2 = vector.shape_cast %1 : vector<1x4x256xf32> to vector<4x256xf32>
    %cst = arith.constant dense<0.000000e+00> : vector<4x256xf32>
    %3 = tpu.matmul %0, %2, %cst {dimension_numbers = #tpu.dot_dimension_numbers<[1], [0], [0], [1], [0, 0, 1, 1], [], []>} : vector<4x4xf32>, vector<4x256xf32>, vector<4x256xf32> -> vector<4x256xf32>
    %c0_4 = arith.constant 0 : index
    %c0_5 = arith.constant 0 : index
    %c0_6 = arith.constant 0 : index
    %4 = vector.load %arg4[%c0_4, %c0_5, %c0_6] : memref<1x4x256xf32, #tpu.memory_space<vmem>>, vector<1x4x256xf32>
    %5 = vector.shape_cast %4 : vector<1x4x256xf32> to vector<4x256xf32>
    %6 = vector.shape_cast %3 : vector<4x256xf32> to vector<1x4x256xf32>
    tpu.vector_store %arg4[%c0_4, %c0_5, %c0_6], %6 {strides = array<i32>} : memref<1x4x256xf32, #tpu.memory_space<vmem>>, vector<1x4x256xf32>,
    return
  }
  func.func @transform_0(%arg0: i32, %arg1: i32) -> (i32, i32) {
    %c0_i32 = arith.constant 0 : i32
    %c0_i32_0 = arith.constant 0 : i32
    %c0_i32_1 = arith.constant 0 : i32
    return %c0_i32, %c0_i32_0 : i32, i32
  }
  func.func @transform_1(%arg0: i32, %arg1: i32) -> (i32, i32, i32) {
    %c0_i32 = arith.constant 0 : i32
    %c0_i32_0 = arith.constant 0 : i32
    return %arg0, %c0_i32, %arg1 : i32, i32, i32
  }
  func.func @transform_2(%arg0: i32, %arg1: i32) -> (i32, i32, i32) {
    %c0_i32 = arith.constant 0 : i32
    %c0_i32_0 = arith.constant 0 : i32
    return %arg0, %c0_i32, %arg1 : i32, i32, i32
  }
}

</mosaic_0001>

<bundles_post_ra>
// kernel: tpu_custom_call.1
= control target key start
LH: loop header
LB: loop body
LE: loop exit
PB: predicated region body
PF: predicated region fallthrough
CT: control target
= control target key end

     0   :  { %7 = vsyncpa [#allocation3], 0  ;;  %s812_s0 = inlined_call_operand.hbm [shape: f32[4,4], index: 0, kind: input, shape index: {}]   ;;  %s813_s1 = inlined_call_operand.hbm [shape: f32[2,4,256], index: 1, kind: input, shape index: {}]   ;;  %s814_s2 = inlined_call_operand.hbm [shape: f32[2,4,256], index: 2, kind: output, shape index: {}]  }
   0x1   :  { %8 = vsyncpa [#allocation6], 0 }
   0x2   :  { %10 = vsyncpa [#allocation6 + $0x1], 0 }
   0x3   :  { %11 = vsyncpa [#allocation4], 0 }
   0x4   :  { %13 = vsyncpa [#allocation4 + $0x1], 0  ;;  %s651_s9 = smov 0   ;;  %s653_s10 = smov 0  }
   0x5   :  { %s655_s11 = smov 0   ;;  %s657_s12 = smov 0  }
   0x6   :  { %s659_s13 = smov 0   ;;  %s661_s14 = smov 0  }
   0x7 LB: > { %s395_s15 = sadd.s32 4294967295, %s630_s14   ;;  %s396_s16 = sadd.s32 4294967294, %s630_s14   ;;  %s630_s14 = sphi %s661_s14, %s19_s14   ;;  %s626_s13 = sphi %s659_s13, %s831_s13   ;;  %s622_s12 = sphi %s657_s12, %s830_s12   ;;  %s618_s11 = sphi %s655_s11, %s829_s11   ;;  %s614_s10 = sphi %s653_s10, %s828_s10   ;;  %s610_s9 = sphi %s651_s9, %s827_s9  }
   0x8   : > { %p74_p0 = scmp.ne.s32.totalorder %s614_s10, %s610_s9  ;;  %p685_p1 = scmp.eq.s32.totalorder %s395_s15, 0 }
   0x9   : > { %p689_p2 = scmp.eq.s32.totalorder %s395_s15, 1  ;;  %p106_p3 = scmp.eq.s32.totalorder %s396_s16, 1 }
   0xa   : > { %p695_p4 = por %p685_p1, %p74_p0  ;;  %p397_p5 = scmp.ge.s32.totalorder %s630_s14, 1 }
   0xb   : > { %p700_p6 = por %p106_p3, %p74_p0  ;;  %p113_p7 = scmp.lt.s32.totalorder %s630_s14, 3 }
   0xc   : > { %s818_s19 = scalar_select %p695_p4, 1, 0 }
   0xd   : > { %s819_s20 = scalar_select %p700_p6, 1, 0 }
   0xe   : > { %p705_p8 = pnand %p397_p5, %p113_p7  ;;  %s632_s22 = smov [#allocation2]  }
   0xf   : > { %s126_s23 = sshll.u32 %s632_s22, 4  ;;  %s31_s25 = sadd.s32 1, %s626_s13  ;;  %s127_s23 = int_to_ptr.vmem [resolvable:$true] %s126_s23 }
  0x10   : > { %p425_p10 = pneg %p705_p8  ;;  %s61_s26 = sadd.s32 1, %s618_s11 }
  0x11   : > { %p33_p12 = scmp.ge.s32.totalorder %s31_s25, 2  ;;  %s503_s27 = scalar_lea.vmem %s127_s23, 64 }
  0x12   : > { %p714_p11 = pnand %p425_p10, %p685_p1  ;;  %p504_p0 = scmp.ne.s32.totalorder %s127_s23, %s503_s27 }
  0x13   : > { %p511_p7 = scmp.lt.s32.totalorder %s127_s23, %s127_s23  ;;  %p512_p6 = scmp.lt.s32.totalorder %s503_s27, %s503_s27 }
  0x14   : > { %p494_p13 = pneg %p714_p11 }
  0x15   : > { %p513_p9 = por %p512_p6, %p511_p7 }
  0x16   : > { %p506_p3 = pnand %p504_p0, %p494_p13 }
  0x18   : > { %p507_p5 = pneg %p506_p3 }
  0x1a   : > { %p514_p4 = pnand %p513_p9, %p507_p5 }
  0x1c   : > { %517 = shalt.err (!%p514_p4)
}
  0x1d   : > { %428 = dma.hbm_to_vmem [thread:$0]  (!%p714_p11), %s812_s0, 64, %s127_s23, [#allocation3]  }
  0x1e   : > { %s833_s25 = smov (%p33_p12, %s31_s25), 0  ;;  %p68_p6 = scmp.ne.s32.totalorder %s618_s11, %s614_s10 }
  0x1f   : > { %p69_p4 = scmp.eq.s32.totalorder %s630_s14, 0  ;;  %s56_s30 = ssub.s32 %s626_s13, %s833_s25 }
  0x20   : > { %p438_p9 = scmp.lt.s32.totalorder %s630_s14, 2  ;;  %p59_p10 = scmp.eq.s32.totalorder %s56_s30, 0 }
  0x21   : > { %p70_p13 = por %p69_p4, %p68_p6  ;;  %p737_p0 = por %p689_p2, %p68_p6 }
  0x22   : > { %s137_s4 = sand.u32 1, %s618_s11   ;;  %s415_s7 = sshll.u32 %s626_s13, 7 }
  0x23   : > { %s743_s5 = scalar_select %p59_p10, %s618_s11, %s61_s26  }
  0x24   : > { %s400_s6 = sshll.u32 %s137_s4, 3  ;;  %s149_s16 = scalar_lea.hbm %s813_s1, %s415_s7 }
  0x25   : > { %s141_s22 = scalar_lea.vmem [#allocation5], %s400_s6  ;;  %p749_p11 = pnand %p438_p9, %p70_p13 }
  0x26   : > { %s151_s23 = sshll.u32 %s141_s22, 4  ;;  %s138_s18 = scalar_lea.sflag [#allocation6], %s137_s4  ;;  %s152_s23 = int_to_ptr.vmem [resolvable:$true] %s151_s23 }
  0x27   : > { %p520_p2 = pneg %p749_p11  ;;  %s531_s27 = scalar_lea.vmem %s152_s23, 128 }
  0x28   : > { %p532_p12 = scmp.ne.s32.totalorder %s152_s23, %s531_s27  ;;  %s633_s26 = smov [#allocation5]  }
  0x29   : > { %s536_s28 = sshll.u32 %s633_s26, 4  ;;  %s537_s28 = int_to_ptr.vmem [resolvable:$false] %s536_s28 }
  0x2a   : > { %p534_p3 = pnand %p532_p12, %p520_p2  ;;  %s538_s29 = scalar_lea.vmem %s537_s28, 256 }
  0x2b   : > { %p539_p7 = scmp.lt.s32.totalorder %s152_s23, %s537_s28  ;;  %p540_p6 = scmp.lt.s32.totalorder %s538_s29, %s531_s27 }
  0x2c   : > { %p535_p5 = pneg %p534_p3 }
  0x2d   : > { %p541_p4 = por %p540_p6, %p539_p7 }
  0x2f   : > { %p542_p10 = pnand %p541_p4, %p535_p5 }
  0x31   : > { %545 = shalt.err (!%p542_p10)
}
  0x32   : > { %432 = dma.hbm_to_vmem [thread:$0]  (!%p749_p11), %s149_s16, 128, %s152_s23, %s138_s18  }
  0x33   : > { %160 = sbr.rel (%p705_p8) target bundleno = 276 (0x114), region = 28 }
  0x38   : > { %597 = dma.done.wait (%p685_p1), [#allocation3], 64  }
  0x39   : > { %599 = vsyncadd (%p685_p1), [#allocation3], 4294967232  ;;  %s764_s30 = sand.u32 1, %s614_s10   ;;  %p824_p9 = scmp.ne.s32.totalorder %s818_s19, 0 }
  0x3a   : > { %s405_s4 = sshll.u32 %s764_s30, 3  ;;  %s167_s6 = scalar_lea.sflag [#allocation6], %s764_s30 }
  0x3b   : > { %s170_s7 = scalar_lea.vmem [#allocation5], %s405_s4 }
  0x3c   : > { %601 = dma.done.wait (%p824_p9), %s167_s6, 128  }
  0x3d   : > { %603 = vsyncadd (%p824_p9), %s167_s6, 4294967168  ;;  %v634_v0 = vmov 0.0   ;;  %v194_v1 = vld [vmem:[%s170_s7] sm:$0xff]  ;;  %vm201_vm0 = vcmask 1043456   ;;  %v193_v3 = vld [vmem:[#allocation2] sm:$0xf] }
  0x3e   : > { %270 = vmatprep.mubr.f32.mxu0 %v634_v0  ;;  %v196_v2 = vcombine.high %v194_v1, %v194_v1  ;;  %vm197_vm1 = vcmask 31744   ;;  %s416_s17 = sshll.u32 %s622_s12, 7  ;;  %s190_s21 = scalar_lea.vmem [#allocation7], %s405_s4 }
  0x3f   : > { %s299_s8 = sshll.u32 %s190_s21, 4  ;;  %s297_s16 = scalar_lea.hbm %s814_s2, %s416_s17  ;;  %s300_s8 = int_to_ptr.vmem [resolvable:$true] %s299_s8 }
  0x40   : > { %407 = vmatprep.subr.msk.mxu0 %vm201_vm0, %v196_v2  ;;  %s283_s22 = scalar_lea.sflag [#allocation4], %s764_s30  ;;  %s546_s23 = scalar_lea.vmem %s300_s8, 128 }
  0x41   : > { %408 = vmatpush1.msk.msra.mxu0 %vm201_vm0, %v194_v1  ;;  %p547_p1 = scmp.ne.s32.totalorder %s300_s8, %s546_s23  ;;  %s635_s24 = smov [#allocation7]  }
  0x42   : > { %409 = vmatmul.mubr.msk.f32.vlgmr.msra.gmra.mxu0 %vm197_vm1, %v193_v3  ;;  %s550_s18 = sshll.u32 %s635_s24, 4  ;;  %s551_s18 = int_to_ptr.vmem [resolvable:$false] %s550_s18 }
  0x43   : > { %p548_p8 = pnand %p547_p1, %p737_p0  ;;  %s552_s12 = scalar_lea.vmem %s551_s18, 256 }
  0x44   : > { %p553_p11 = scmp.lt.s32.totalorder %s300_s8, %s551_s18  ;;  %p554_p2 = scmp.lt.s32.totalorder %s552_s12, %s546_s23 }
  0x45   : > { %p549_p13 = pneg %p548_p8 }
  0x46   : > { %p555_p12 = por %p554_p2, %p553_p11 }
  0x48   : > { %p556_p3 = pnand %p555_p12, %p549_p13 }
 0x102   : > { %v272_v4 = vpop.f32.mrf.mxu0 }
 0x104   : > { %v274_v5 = vpop.f32.mrf.mxu0 }
 0x105   : > { %v279_v6 = vcombine.low %v272_v4, %v274_v5 }
 0x107   : > { %281 = vst [vmem:[%s190_s21] sm:$0xff] %v279_v6 }
 0x108   : > { %559 = shalt.err (!%p556_p3)
}
 0x109   : > { %s560_s27 = scalar_lea.hbm %s297_s16, 128  ;;  %s564_s29 = scalar_lea.hbm %s814_s2, 256 }
 0x10a   : > { %p561_p5 = scmp.ne.s32.totalorder %s297_s16, %s560_s27  ;;  %p565_p4 = scmp.lt.s32.totalorder %s297_s16, %s814_s2 }
 0x10b   : > { %p566_p10 = scmp.lt.s32.totalorder %s564_s29, %s560_s27 }
 0x10c   : > { %p562_p7 = pnand %p561_p5, %p737_p0 }
 0x10d   : > { %p567_p9 = por %p566_p10, %p565_p4 }
 0x10e   : > { %p563_p6 = pneg %p562_p7 }
 0x110   : > { %p568_p1 = pnand %p567_p9, %p563_p6 }
 0x112   : > { %571 = shalt.err (!%p568_p1)
}
 0x113   : > { %423 = dma.vmem_to_hbm [thread:$0]  (%p737_p0), %s300_s8, 128, %s297_s16, %s283_s22  }
 0x114 PF: > { %s311_s6 = sand.u32 1, %s610_s9   ;;  %p825_p8 = scmp.ne.s32.totalorder %s819_s20, 0 }
 0x115   : > { %p826_p13 = scmp.ge.s32.totalorder %s630_s14, 2  ;;  %s312_s7 = scalar_lea.sflag [#allocation4], %s311_s6 }
 0x117   : > { %p434_p11 = pnand %p826_p13, %p825_p8 }
 0x119   : > { %p435_p2 = pneg %p434_p11 }
 0x11b   : > { %605 = dma.done.wait (%p435_p2), %s312_s7, 128  }
 0x11c   : > { %607 = vsyncadd (%p435_p2), %s312_s7, 4294967168  ;;  %s19_s14 = sadd.s32 1, %s630_s14   ;;  %s827_s9 = smov %s614_s10 }
 0x11d   : > { %p16_p12 = scmp.ge.s32.totalorder %s19_s14, 4   ;;  %s828_s10 = smov %s618_s11 }
 0x11e   : > { %s829_s11 = smov %s743_s5  ;;  %s830_s12 = smov %s626_s13 }
 0x11f   : > { %s831_s13 = smov %s833_s25  ;;  %18 = sbr.rel (!%p16_p12) target bundleno = 7 (0x7), region = 78 }
 0x124   :  { %317 = vsyncpa [#allocation3], 1 }
 0x125   :  { %319 = vsyncpa [#allocation3 + $0x1], 1 }
 0x126   :  { %320 = vsyncpa [#allocation6], 1 }
 0x127   :  { %322 = vsyncpa [#allocation6 + $0x1], 1 }
 0x128   :  { %323 = vsyncpa [#allocation4], 1 }
 0x129   :  { %325 = vsyncpa [#allocation4 + $0x1], 1 }

</bundles_post_ra>
